<compile_context>
chip_gen: v6e
topology: v6e:2x2x1
jax: 0.10.0
libtpu: 0.0.40
codegen_flags: <defaults>
</compile_context>

<pallas_src>
import jax
import jax.numpy as jnp
from jax.experimental import pallas as pl
from jax.experimental.pallas import tpu as pltpu


# ----------------------------------------------------------------------------
# Tiling / VMEM-budget helpers
# ----------------------------------------------------------------------------
_TK_TARGET = 512      # feature-dim tile target (review: 512-1024)
_TN_TARGET = 2048     # gallery-dim (lane) tile target (review: 2048)
_TM_MAX = 256         # query-row tile cap once 2B grows past this


def _round_up(v, m):
    return (v + m - 1) // m * m


def _vmem_budget_bytes():
    """Generation-aware scoped-VMEM budget (leaves headroom for compiler
    scratch): ~40 MiB on v7x (64 MiB/TC), ~80 MiB on v5e/v6e (128 MiB)."""
    cap = 64 * 1024 * 1024  # conservative fallback = v7x per-TC size
    try:
        info = pltpu.get_tpu_info()
        cap = int(getattr(info, "vmem_capacity_bytes", cap))
    except Exception:
        pass
    return max(16 << 20, min(cap * 5 // 8, 96 << 20))


def _buf_bytes(rows, cols, dtype):
    """Single VMEM buffer size including (8,128)/(16,128) layout padding."""
    itemsize = jnp.dtype(dtype).itemsize
    sub = max(8, 32 // itemsize)
    return _round_up(max(rows, 1), sub) * _round_up(max(cols, 1), 128) * itemsize


# ----------------------------------------------------------------------------
# Pallas kernel: pairwise euclidean distance (cross-term matmul + epilogue)
# ----------------------------------------------------------------------------
def _dist_kernel(x_ref, yt_ref, xx_ref, yy_ref, o_ref):
    """Grid = (M tiles, N tiles, K tiles); K last ("arbitrary").
    X @ Y^T accumulates directly into the VMEM-resident output block; the
    precomputed ||x||^2 / ||y||^2 are folded in (with -2, clamp, sqrt) only on
    the last K step. The body is pure MXU work -> HBM-bandwidth bound."""
    kk = pl.program_id(2)

    @pl.when(kk == 0)
    def _():
        o_ref[...] = jnp.zeros_like(o_ref)

    o_ref[...] += jnp.dot(x_ref[...], yt_ref[...],
                          preferred_element_type=jnp.float32)

    @pl.when(kk == pl.num_programs(2) - 1)
    def _():
        d = xx_ref[...] + yy_ref[...] - 2.0 * o_ref[...]
        o_ref[...] = jnp.sqrt(jnp.maximum(d, 1e-12))


# ----------------------------------------------------------------------------
# Gallery cache (padded + transposed once per bank) and distance wrapper
# ----------------------------------------------------------------------------
def prepare_gallery(gallery, matmul_dtype=jnp.float32):
    """Pad / transpose the teacher bank once and precompute ||y||^2 (f32)."""
    g = jnp.asarray(gallery, jnp.float32)
    n, d = g.shape
    d_pad = _round_up(d, 128) if d <= _TK_TARGET else _round_up(d, _TK_TARGET)
    n_pad = _round_up(n, 128) if n <= _TN_TARGET else _round_up(n, _TN_TARGET)
    g = jnp.pad(g, ((0, n_pad - n), (0, d_pad - d)))
    y_sq = jnp.sum(g * g, axis=1).reshape(1, n_pad)       # f32, from unquantized
    yt = g.T.astype(matmul_dtype)                         # [d_pad, n_pad], once
    return {"yt": yt, "y_sq": y_sq, "n": n, "d": d,
            "n_pad": n_pad, "d_pad": d_pad, "matmul_dtype": matmul_dtype}


def euclidean_dist_pallas(x, cache):
    """x: [m, d] (f32) queries vs cached gallery -> [m, n] euclidean dists."""
    x = jnp.asarray(x, jnp.float32)
    m, d = x.shape
    assert d == cache["d"], "query feature dim must match the teacher bank"
    d_pad, n_pad = cache["d_pad"], cache["n_pad"]
    mm_dtype = cache["matmul_dtype"]

    # Pad query rows so every store is an unmasked, sublane-aligned tile.
    sub = max(8, 32 // jnp.dtype(mm_dtype).itemsize)
    if m <= _TM_MAX:
        tm = _round_up(m, sub)
        m_pad = tm
    else:
        tm = _TM_MAX
        m_pad = _round_up(m, tm)
    x = jnp.pad(x, ((0, m_pad - m), (0, d_pad - d)))

    x_sq = jnp.sum(x * x, axis=1, keepdims=True)           # [m_pad, 1] f32, once
    x_mm = x.astype(mm_dtype)

    budget = _vmem_budget_bytes()
    tk = d_pad if d_pad <= _TK_TARGET else _TK_TARGET

    def working_set(tk_, tn_):
        return 2 * (_buf_bytes(tm, tk_, mm_dtype)            # x block
                    + _buf_bytes(tk_, tn_, mm_dtype)         # yt block
                    + _buf_bytes(tm, tn_, jnp.float32)        # resident output
                    + _buf_bytes(tm, 1, jnp.float32)          # ||x||^2
                    + _buf_bytes(1, tn_, jnp.float32)         # ||y||^2
                    ) + (2 << 20)                             # margin

    # Widest lane-dense output tile that fits the budget (never < 128).
    if n_pad <= _TN_TARGET:
        tn_cands = [n_pad] + [t for t in (1024, 512, 256, 128)
                              if t < n_pad and n_pad % t == 0]
    else:
        tn_cands = [t for t in (2048, 1024, 512, 256, 128) if n_pad % t == 0]
    tn = tn_cands[-1]
    for cand in tn_cands:
        if working_set(tk, cand) <= budget:
            tn = cand
            break

    # If the full-depth working set fits, use a single K step: the x block then
    # stays resident per M-tile (no re-streaming of x per gallery tile).
    if tk < d_pad and working_set(d_pad, tn) <= budget:
        tk = d_pad

    grid = (m_pad // tm, n_pad // tn, d_pad // tk)

    out = pl.pallas_call(
        _dist_kernel,
        out_shape=jax.ShapeDtypeStruct((m_pad, n_pad), jnp.float32),
        grid_spec=pltpu.PrefetchScalarGridSpec(
            num_scalar_prefetch=0,
            grid=grid,
            in_specs=[
                pl.BlockSpec((tm, tk), lambda i, j, kk: (i, kk)),
                # TODO(synk): sweep pipeline_mode=pl.Buffered(3) here on v7x.
                pl.BlockSpec((tk, tn), lambda i, j, kk: (kk, j)),
                pl.BlockSpec((tm, 1), lambda i, j, kk: (i, 0)),
                pl.BlockSpec((1, tn), lambda i, j, kk: (0, j)),
            ],
            out_specs=pl.BlockSpec((tm, tn), lambda i, j, kk: (i, j)),
        ),
        compiler_params=pltpu.CompilerParams(
            dimension_semantics=("parallel", "parallel", "arbitrary"),
            vmem_limit_bytes=int(budget),
        ),
    )(x_mm, cache["yt"], x_sq, cache["y_sq"])
    return out[:m, :cache["n"]]


# ----------------------------------------------------------------------------
# Loss tail in plain JAX (off the hot path; k ~ 4 -> a Pallas launch costs
# more than the compute, per perf review).
# ----------------------------------------------------------------------------
def acrd_loss_tail(t_value, s_value, alpha, beta, mode='l2'):
    t = t_value.astype(jnp.float32)
    s = s_value.astype(jnp.float32)
    main_loss = alpha * jnp.mean(jnp.abs(s[:, 0] - t[:, 0]))

    k1 = t.shape[1] - 1  # repeat_size
    if k1 == 0:
        # TODO(synk): the PyTorch reference divides by repeat_size == 0 here
        # (hard error); we define the rank term as 0 for k == 1.
        return main_loss

    def smooth_rank(v):                       # v: [B, k-1]
        diff = v[:, :, None] - v[:, None, :]  # [B, k-1, k-1], diff[b,i,j]=v[b,i]-v[b,j]
        sg = jnp.maximum(diff, 0.0) if mode == 'l2' else jnp.maximum(-diff, 0.0)
        return jnp.sum(sg, axis=-1)           # [B, k-1]

    d = smooth_rank(t[:, 1:]) - smooth_rank(s[:, 1:])
    extra_loss = beta * jnp.mean(jnp.sqrt(jnp.sum(d * d, axis=1))) / float(k1)
    return main_loss + extra_loss


# ----------------------------------------------------------------------------
# ACRD module (JAX / Pallas version)
# ----------------------------------------------------------------------------
class ACRD:
    def __init__(self, p, k, alpha, beta, mode='l2', pool='all',
                 matmul_dtype=jnp.float32):
        self.p = p
        self.k = k
        self.alpha = alpha
        self.beta = beta
        self.mode = mode
        self.pool = pool
        # bf16 halves gallery HBM bytes (~2x on the bandwidth roofline, biggest
        # on v5e) at the cost of small top-k ordering perturbations vs the f64
        # PyTorch reference; default f32 keeps semantics closest.
        self.matmul_dtype = matmul_dtype
        # Host-side teacher feature banks, same semantics as the PyTorch module.
        self.teacher_features = []
        self.teacher_features1 = []
        # Per-layer cache of the padded/transposed gallery + its ||y||^2,
        # rebuilt only when the bank object changes (statistics concat).
        self._gallery_cache = {0: None, 1: None}

    def _prep(self, f):
        b = f.shape[0]
        if self.pool == 'gap':
            f = jnp.mean(f ** self.p, axis=(2, 3)).reshape(b, -1)
        elif self.pool == 'cap':
            f = jnp.mean(f ** self.p, axis=1).reshape(b, -1)
        else:  # 'all'
            f = (f ** self.p).reshape(b, -1)
        return f.astype(jnp.float32)

    def _get_gallery_cache(self, layer, gallery):
        cache = self._gallery_cache.get(layer)
        if cache is None or (cache.get("bank_ref") is not gallery):
            cache = prepare_gallery(gallery, self.matmul_dtype)
            cache["bank_ref"] = gallery
            self._gallery_cache[layer] = cache
        return cache

    def forward(self, g_s, g_t, statistics):
        return sum(
            self.acrd_loss(f_s, f_t, layer, statistics)
            for layer, (f_s, f_t) in enumerate(zip(g_s, g_t))
        )

    def acrd_loss(self, f_s, f_t, layer, statistics):
        f_s = self._prep(f_s)
        f_t = self._prep(f_t)

        if statistics:
            if layer == 0:
                if len(self.teacher_features) == 0:
                    self.teacher_features = f_t
                else:
                    self.teacher_features = jnp.concatenate(
                        [self.teacher_features, f_t], axis=0)
                self._gallery_cache[0] = None
            elif layer == 1:
                if len(self.teacher_features1) == 0:
                    self.teacher_features1 = f_t
                else:
                    self.teacher_features1 = jnp.concatenate(
                        [self.teacher_features1, f_t], axis=0)
                self._gallery_cache[1] = None

        if self.mode != 'l2':
            # TODO(synk): cosine mode not implemented in this Pallas port.
            raise NotImplementedError("only mode='l2' is implemented")

        gallery = self.teacher_features if layer == 0 else self.teacher_features1
        cache = self._get_gallery_cache(layer, gallery)
        b = f_t.shape[0]

        # Fused hot path: stack teacher + student queries so the gallery is
        # streamed from HBM only once (and the MXU M dimension doubles).
        x_all = jnp.concatenate([f_t, f_s], axis=0)            # [2B, D]
        dist_all = euclidean_dist_pallas(x_all, cache)         # [2B, G]
        tt_dist, ss_dist = dist_all[:b], dist_all[b:]

        # k smallest teacher distances: O(G) top_k instead of a full argsort.
        k = min(self.k, tt_dist.shape[1])
        neg_val, idx = jax.lax.top_k(-tt_dist, k)              # [B, k]
        t_value = -neg_val                                     # ascending dists
        # s_value[i, j] == euclidean_dist(f_s[i], gallery[idx[i, j]])
        s_value = jnp.take_along_axis(ss_dist, idx, axis=1)    # [B, k]
        # TODO(synk): for very large banks, gather only the k selected gallery
        # rows per query and compute B*k student distances instead of ss_dist.

        return acrd_loss_tail(t_value, s_value, self.alpha, self.beta, self.mode)


# ----------------------------------------------------------------------------
# Demo
# ----------------------------------------------------------------------------
if __name__ == "__main__":
    key = jax.random.PRNGKey(0)
    ks = jax.random.split(key, 6)

    # Two "layers" of student/teacher conv features (NCHW).
    s0 = jax.random.normal(ks[0], (2, 4, 16, 16), jnp.float32)
    t0 = jax.random.normal(ks[1], (2, 4, 16, 16), jnp.float32)
    s1 = jax.random.normal(ks[2], (2, 8, 8, 8), jnp.float32)
    t1 = jax.random.normal(ks[3], (2, 8, 8, 8), jnp.float32)

    # Teacher feature banks, as if accumulated by earlier statistics passes.
    bank0 = jax.random.normal(ks[4], (8, 4, 16, 16), jnp.float32)
    bank1 = jax.random.normal(ks[5], (8, 8, 8, 8), jnp.float32)

    acrd = ACRD(p=2, k=4, alpha=1.0, beta=2.0, mode='l2', pool='all')
    acrd.teacher_features = acrd._prep(bank0)    # [8, 1024]
    acrd.teacher_features1 = acrd._prep(bank1)   # [8, 512]

    loss = acrd.forward([s0, s1], [t0, t1], statistics=True)
    jax.block_until_ready(loss)

    # Second forward (statistics=False): exercises the cached gallery path.
    loss2 = acrd.forward([s0, s1], [t0, t1], statistics=False)
    jax.block_until_ready(loss2)

    print("KERNEL_OK")
</pallas_src>

<mosaic_0001>
module attributes {stable_mosaic.version = 11 : i64} {
  func.func @_dist_kernel(%arg0: i32, %arg1: i32, %arg2: i32, %arg3: memref<8x1024xf32, #tpu.memory_space<vmem>>, %arg4: memref<1024x128xf32, #tpu.memory_space<vmem>>, %arg5: memref<8x1xf32, #tpu.memory_space<vmem>>, %arg6: memref<1x128xf32, #tpu.memory_space<vmem>>, %arg7: memref<8x128xf32, #tpu.memory_space<vmem>>) attributes {dimension_semantics = [#tpu.dimension_semantics<parallel>, #tpu.dimension_semantics<parallel>, #tpu.dimension_semantics<arbitrary>], iteration_bounds = array<i64: 1, 1, 1>, scalar_prefetch = 0 : i64, scratch_operands = 0 : i64, tpu.core_type = #tpu.core_type<tc>, window_params = [{transform_indices = @transform_0, window_bounds = array<i64: 8, 1024>}, {transform_indices = @transform_1, window_bounds = array<i64: 1024, 128>}, {transform_indices = @transform_2, window_bounds = array<i64: 8, 1>}, {transform_indices = @transform_3, window_bounds = array<i64: 1, 128>}, {transform_indices = @transform_4, window_bounds = array<i64: 8, 128>}]} {
    %c0_i32 = arith.constant 0 : i32
    %0 = arith.cmpi eq, %arg2, %c0_i32 : i32
    %1 = arith.extui %0 : i1 to i32
    %c0_i32_0 = arith.constant 0 : i32
    %2 = arith.cmpi ne, %1, %c0_i32_0 : i32
    scf.if %2 {
      %cst_10 = arith.constant 0.000000e+00 : f32
      %12 = vector.broadcast %cst_10 : f32 to vector<8x128xf32>
      %c0_11 = arith.constant 0 : index
      %c0_12 = arith.constant 0 : index
      %13 = vector.load %arg7[%c0_11, %c0_12] : memref<8x128xf32, #tpu.memory_space<vmem>>, vector<8x128xf32>
      tpu.vector_store %arg7[%c0_11, %c0_12], %12 {strides = array<i32>} : memref<8x128xf32, #tpu.memory_space<vmem>>, vector<8x128xf32>,
    } else {
    }
    %c0 = arith.constant 0 : index
    %c0_1 = arith.constant 0 : index
    %3 = vector.load %arg7[%c0, %c0_1] : memref<8x128xf32, #tpu.memory_space<vmem>>, vector<8x128xf32>
    %c0_2 = arith.constant 0 : index
    %c0_3 = arith.constant 0 : index
    %4 = vector.load %arg3[%c0_2, %c0_3] : memref<8x1024xf32, #tpu.memory_space<vmem>>, vector<8x1024xf32>
    %c0_4 = arith.constant 0 : index
    %c0_5 = arith.constant 0 : index
    %5 = vector.load %arg4[%c0_4, %c0_5] : memref<1024x128xf32, #tpu.memory_space<vmem>>, vector<1024x128xf32>
    %cst = arith.constant dense<0.000000e+00> : vector<8x128xf32>
    %6 = tpu.matmul %4, %5, %cst {dimension_numbers = #tpu.dot_dimension_numbers<[1], [0], [0], [1], [0, 0, 1, 1], [], []>} : vector<8x1024xf32>, vector<1024x128xf32>, vector<8x128xf32> -> vector<8x128xf32>
    %7 = arith.addf %3, %6 : vector<8x128xf32>
    %c0_6 = arith.constant 0 : index
    %c0_7 = arith.constant 0 : index
    %8 = vector.load %arg7[%c0_6, %c0_7] : memref<8x128xf32, #tpu.memory_space<vmem>>, vector<8x128xf32>
    tpu.vector_store %arg7[%c0_6, %c0_7], %7 {strides = array<i32>} : memref<8x128xf32, #tpu.memory_space<vmem>>, vector<8x128xf32>,
    %c0_i32_8 = arith.constant 0 : i32
    %9 = arith.cmpi eq, %arg2, %c0_i32_8 : i32
    %10 = arith.extui %9 : i1 to i32
    %c0_i32_9 = arith.constant 0 : i32
    %11 = arith.cmpi ne, %10, %c0_i32_9 : i32
    scf.if %11 {
      %c0_10 = arith.constant 0 : index
      %c0_11 = arith.constant 0 : index
      %12 = vector.load %arg5[%c0_10, %c0_11] : memref<8x1xf32, #tpu.memory_space<vmem>>, vector<8x1xf32>
      %c0_12 = arith.constant 0 : index
      %c0_13 = arith.constant 0 : index
      %13 = vector.load %arg6[%c0_12, %c0_13] : memref<1x128xf32, #tpu.memory_space<vmem>>, vector<1x128xf32>
      %14 = vector.broadcast %12 : vector<8x1xf32> to vector<8x128xf32>
      %15 = vector.broadcast %13 : vector<1x128xf32> to vector<8x128xf32>
      %16 = arith.addf %14, %15 : vector<8x128xf32>
      %c0_14 = arith.constant 0 : index
      %c0_15 = arith.constant 0 : index
      %17 = vector.load %arg7[%c0_14, %c0_15] : memref<8x128xf32, #tpu.memory_space<vmem>>, vector<8x128xf32>
      %cst_16 = arith.constant 2.000000e+00 : f32
      %18 = vector.broadcast %cst_16 : f32 to vector<8x128xf32>
      %19 = arith.mulf %18, %17 : vector<8x128xf32>
      %20 = arith.subf %16, %19 : vector<8x128xf32>
      %cst_17 = arith.constant 9.99999996E-13 : f32
      %21 = vector.broadcast %cst_17 : f32 to vector<8x128xf32>
      %22 = arith.maximumf %20, %21 : vector<8x128xf32>
      %23 = math.sqrt %22 : vector<8x128xf32>
      %c0_18 = arith.constant 0 : index
      %c0_19 = arith.constant 0 : index
      %24 = vector.load %arg7[%c0_18, %c0_19] : memref<8x128xf32, #tpu.memory_space<vmem>>, vector<8x128xf32>
      tpu.vector_store %arg7[%c0_18, %c0_19], %23 {strides = array<i32>} : memref<8x128xf32, #tpu.memory_space<vmem>>, vector<8x128xf32>,
    } else {
    }
    return
  }
  func.func @transform_0(%arg0: i32, %arg1: i32, %arg2: i32) -> (i32, i32) {
    %c0_i32 = arith.constant 0 : i32
    return %arg0, %arg2 : i32, i32
  }
  func.func @transform_1(%arg0: i32, %arg1: i32, %arg2: i32) -> (i32, i32) {
    %c0_i32 = arith.constant 0 : i32
    return %arg2, %arg1 : i32, i32
  }
  func.func @transform_2(%arg0: i32, %arg1: i32, %arg2: i32) -> (i32, i32) {
    %c0_i32 = arith.constant 0 : i32
    %c0_i32_0 = arith.constant 0 : i32
    return %arg0, %c0_i32 : i32, i32
  }
  func.func @transform_3(%arg0: i32, %arg1: i32, %arg2: i32) -> (i32, i32) {
    %c0_i32 = arith.constant 0 : i32
    %c0_i32_0 = arith.constant 0 : i32
    return %c0_i32, %arg1 : i32, i32
  }
  func.func @transform_4(%arg0: i32, %arg1: i32, %arg2: i32) -> (i32, i32) {
    %c0_i32 = arith.constant 0 : i32
    return %arg0, %arg1 : i32, i32
  }
}

</mosaic_0001>

<bundles_post_ra>
// kernel: tpu_custom_call.1
= control target key start
LH: loop header
LB: loop body
LE: loop exit
PB: predicated region body
PF: predicated region fallthrough
CT: control target
= control target key end

     0   :  { %9 = vsyncpa [#allocation3], 0  ;;  %s776_s0 = inlined_call_operand.hbm [shape: f32[8,1024], index: 0, kind: input, shape index: {}]   ;;  %s777_s1 = inlined_call_operand.hbm [shape: f32[1024,128], index: 1, kind: input, shape index: {}]   ;;  %s778_s2 = inlined_call_operand.vmem [shape: f32[8,1], index: 2, kind: input, shape index: {}]   ;;  %s779_s3 = inlined_call_operand.vmem [shape: f32[1,128], index: 3, kind: input, shape index: {}]   ;;  %s780_s4 = inlined_call_operand.hbm [shape: f32[8,128], index: 4, kind: output, shape index: {}]  }
   0x1   :  { %10 = vsyncpa [#allocation6], 0 }
   0x2   :  { %11 = vsyncpa [#allocation4], 0  ;;  %s730_s15 = smov [#allocation2]   ;;  %s731_s17 = smov [#allocation5]  }
   0x3   :  { %s18_s16 = sshll.u32 %s730_s15, 4  ;;  %s27_s18 = sshll.u32 %s731_s17, 4  ;;  %s19_s16 = int_to_ptr.vmem [resolvable:$true] %s18_s16  ;;  %s28_s18 = int_to_ptr.vmem [resolvable:$true] %s27_s18 }
   0x4   :  { %s672_s19 = scalar_lea.vmem %s19_s16, 1024  ;;  %p677_p1 = scmp.lt.s32.totalorder %s19_s16, %s19_s16 }
   0x5   :  { %p673_p0 = scmp.ne.s32.totalorder %s19_s16, %s672_s19  ;;  %p678_p2 = scmp.lt.s32.totalorder %s672_s19, %s672_s19 }
   0x7   :  { %p679_p3 = por %p678_p2, %p677_p1 }
   0x9   :  { %p680_p4 = pnand %p679_p3, %p673_p0 }
   0xb   :  { %683 = shalt.err (!%p680_p4)
}
   0xc   :  { %21 = dma.hbm_to_vmem [thread:$0]  %s776_s0, 1024, %s19_s16, [#allocation3]  }
   0xd   :  { %s692_s22 = scalar_lea.vmem %s28_s18, 16384  ;;  %p697_p6 = scmp.lt.s32.totalorder %s28_s18, %s28_s18 }
   0xe   :  { %p693_p5 = scmp.ne.s32.totalorder %s28_s18, %s692_s22  ;;  %p698_p7 = scmp.lt.s32.totalorder %s692_s22, %s692_s22 }
  0x10   :  { %p699_p8 = por %p698_p7, %p697_p6 }
  0x12   :  { %p700_p9 = pnand %p699_p8, %p693_p5 }
  0x14   :  { %703 = shalt.err (!%p700_p9)
}
  0x15   :  { %s732_s23 = smov 128   ;;  %s733_s24 = smov 8  }
  0x16   :  { %33 = dma.hbm_to_vmem [thread:$0]  %s777_s1, 16384, %s28_s18, [#allocation6], %s732_s23, %s732_s23, %s733_s24  }
  0x17   :  { %724 = dma.done.wait [#allocation3], 1024  }
  0x18   :  { %725 = vsyncadd [#allocation3], 4294966272 }
  0x19   :  { %726 = dma.done.wait [#allocation6], 16384  }
  0x1a   :  { %727 = vsyncadd [#allocation6], 4294950912  ;;  %v734_v0 = vmov 0   ;;  %v89_v1 = vld [vmem:[#allocation5 + $0xf8] sm:$0xff]  ;;  %v88_v5 = vld [vmem:[#allocation5 + $0xf0] sm:$0xff]  ;;  %s735_s28 = smov [#allocation7]  }
  0x1b   :  { %661 = vset.pattern.permute.xlu0 %v734_v0  ;;  %v121_v2 = vld [vmem:[#allocation5 + $0x1f8] sm:$0xff]  ;;  %514 = vmatprep.subr.mxu0 %v89_v1  ;;  %v120_v6 = vld [vmem:[#allocation5 + $0x1f0] sm:$0xff]  ;;  %v87_v9 = vld [vmem:[#allocation5 + $0xe8] sm:$0xff]  ;;  %s503_s29 = sshll.u32 %s735_s28, 4  ;;  %s504_s29 = int_to_ptr.vmem [resolvable:$true] %s503_s29 }
  0x1c   :  { %v73_v3 = vld [vmem:[#allocation5 + $0x78] sm:$0xff]  ;;  %549 = vmatprep.subr.mxu1 %v121_v2  ;;  %v72_v7 = vld [vmem:[#allocation5 + $0x70] sm:$0xff]  ;;  %v119_v10 = vld [vmem:[#allocation5 + $0x1e8] sm:$0xff]  ;;  %s704_s30 = scalar_lea.vmem %s504_s29, 128  ;;  %p709_p11 = scmp.lt.s32.totalorder %s504_s29, %s504_s29 }
  0x1d   :  { %v105_v4 = vld [vmem:[#allocation5 + $0x178] sm:$0xff]  ;;  %515 = vmatpush3.msra.mxu0 %v73_v3  ;;  %v104_v8 = vld [vmem:[#allocation5 + $0x170] sm:$0xff]  ;;  %v71_v11 = vld [vmem:[#allocation5 + $0x68] sm:$0xff]  ;;  %p705_p10 = scmp.ne.s32.totalorder %s504_s29, %s704_s30  ;;  %p710_p12 = scmp.lt.s32.totalorder %s704_s30, %s704_s30 }
  0x1e   :  { %550 = vmatpush3.msra.mxu1 %v105_v4  ;;  %516 = vmatprep.subr.mxu0 %v88_v5  ;;  %v103_v12 = vld [vmem:[#allocation5 + $0x168] sm:$0xff]  ;;  %v86_v13 = vld [vmem:[#allocation5 + $0xe0] sm:$0xff]  ;;  %v85_v17 = vld [vmem:[#allocation5 + $0xd8] sm:$0xff] }
  0x1f   :  { %551 = vmatprep.subr.mxu1 %v120_v6  ;;  %517 = vmatpush3.msra.mxu0 %v72_v7  ;;  %v118_v14 = vld [vmem:[#allocation5 + $0x1e0] sm:$0xff]  ;;  %v117_v18 = vld [vmem:[#allocation5 + $0x1d8] sm:$0xff]  ;;  %v84_v21 = vld [vmem:[#allocation5 + $0xd0] sm:$0xff]  ;;  %p711_p13 = por %p710_p12, %p709_p11 }
  0x20   :  { %552 = vmatpush3.msra.mxu1 %v104_v8  ;;  %518 = vmatprep.subr.mxu0 %v87_v9  ;;  %v70_v15 = vld [vmem:[#allocation5 + $0x60] sm:$0xff]  ;;  %v69_v19 = vld [vmem:[#allocation5 + $0x58] sm:$0xff]  ;;  %v116_v22 = vld [vmem:[#allocation5 + $0x1d0] sm:$0xff] }
  0x21   :  { %553 = vmatprep.subr.mxu1 %v119_v10  ;;  %v102_v16 = vld [vmem:[#allocation5 + $0x160] sm:$0xff]  ;;  %519 = vmatpush3.msra.mxu0 %v71_v11  ;;  %v101_v20 = vld [vmem:[#allocation5 + $0x158] sm:$0xff]  ;;  %v68_v23 = vld [vmem:[#allocation5 + $0x50] sm:$0xff]  ;;  %p712_p0 = pnand %p711_p13, %p705_p10 }
  0x22   :  { %554 = vmatpush3.msra.mxu1 %v103_v12  ;;  %520 = vmatprep.subr.mxu0 %v86_v13  ;;  %v100_v24 = vld [vmem:[#allocation5 + $0x150] sm:$0xff]  ;;  %v83_v25 = vld [vmem:[#allocation5 + $0xc8] sm:$0xff]  ;;  %v82_v29 = vld [vmem:[#allocation5 + $0xc0] sm:$0xff] }
  0x23   :  { %555 = vmatprep.subr.mxu1 %v118_v14  ;;  %521 = vmatpush3.msra.mxu0 %v70_v15  ;;  %v115_v26 = vld [vmem:[#allocation5 + $0x1c8] sm:$0xff]  ;;  %v114_v30 = vld [vmem:[#allocation5 + $0x1c0] sm:$0xff]  ;;  %v81_v33 = vld [vmem:[#allocation5 + $0xb8] sm:$0xff] }
  0x24   :  { %556 = vmatpush3.msra.mxu1 %v102_v16  ;;  %522 = vmatprep.subr.mxu0 %v85_v17  ;;  %v67_v27 = vld [vmem:[#allocation5 + $0x48] sm:$0xff]  ;;  %v66_v31 = vld [vmem:[#allocation5 + $0x40] sm:$0xff]  ;;  %v113_v34 = vld [vmem:[#allocation5 + $0x1b8] sm:$0xff] }
  0x25   :  { %557 = vmatprep.subr.mxu1 %v117_v18  ;;  %523 = vmatpush3.msra.mxu0 %v69_v19  ;;  %v99_v28 = vld [vmem:[#allocation5 + $0x148] sm:$0xff]  ;;  %v98_v32 = vld [vmem:[#allocation5 + $0x140] sm:$0xff]  ;;  %v65_v35 = vld [vmem:[#allocation5 + $0x38] sm:$0xff] }
  0x26   :  { %558 = vmatpush3.msra.mxu1 %v101_v20  ;;  %524 = vmatprep.subr.mxu0 %v84_v21  ;;  %v97_v36 = vld [vmem:[#allocation5 + $0x138] sm:$0xff]  ;;  %v80_v37 = vld [vmem:[#allocation5 + $0xb0] sm:$0xff]  ;;  %v79_v41 = vld [vmem:[#allocation5 + $0xa8] sm:$0xff] }
  0x27   :  { %559 = vmatprep.subr.mxu1 %v116_v22  ;;  %525 = vmatpush3.msra.mxu0 %v68_v23  ;;  %v112_v38 = vld [vmem:[#allocation5 + $0x1b0] sm:$0xff]  ;;  %v111_v42 = vld [vmem:[#allocation5 + $0x1a8] sm:$0xff]  ;;  %v78_v45 = vld [vmem:[#allocation5 + $0xa0] sm:$0xff] }
  0x28   :  { %560 = vmatpush3.msra.mxu1 %v100_v24  ;;  %526 = vmatprep.subr.mxu0 %v83_v25  ;;  %v64_v39 = vld [vmem:[#allocation5 + $0x30] sm:$0xff]  ;;  %v63_v43 = vld [vmem:[#allocation5 + $0x28] sm:$0xff]  ;;  %v110_v46 = vld [vmem:[#allocation5 + $0x1a0] sm:$0xff] }
  0x29   :  { %561 = vmatprep.subr.mxu1 %v115_v26  ;;  %527 = vmatpush3.msra.mxu0 %v67_v27  ;;  %v96_v40 = vld [vmem:[#allocation5 + $0x130] sm:$0xff]  ;;  %v95_v44 = vld [vmem:[#allocation5 + $0x128] sm:$0xff]  ;;  %v62_v47 = vld [vmem:[#allocation5 + $0x20] sm:$0xff] }
  0x2a   :  { %562 = vmatpush3.msra.mxu1 %v99_v28  ;;  %528 = vmatprep.subr.mxu0 %v82_v29  ;;  %v94_v48 = vld [vmem:[#allocation5 + $0x120] sm:$0xff]  ;;  %v77_v49 = vld [vmem:[#allocation5 + $0x98] sm:$0xff]  ;;  %v76_v53 = vld [vmem:[#allocation5 + $0x90] sm:$0xff] }
  0x2b   :  { %563 = vmatprep.subr.mxu1 %v114_v30  ;;  %529 = vmatpush3.msra.mxu0 %v66_v31  ;;  %v109_v50 = vld [vmem:[#allocation5 + $0x198] sm:$0xff]  ;;  %v108_v54 = vld [vmem:[#allocation5 + $0x190] sm:$0xff]  ;;  %v75_v57 = vld [vmem:[#allocation5 + $0x88] sm:$0xff] }
  0x2c   :  { %564 = vmatpush3.msra.mxu1 %v98_v32  ;;  %530 = vmatprep.subr.mxu0 %v81_v33  ;;  %v61_v51 = vld [vmem:[#allocation5 + $0x18] sm:$0xff]  ;;  %v60_v55 = vld [vmem:[#allocation5 + $0x10] sm:$0xff]  ;;  %v107_v58 = vld [vmem:[#allocation5 + $0x188] sm:$0xff] }
  0x2d   :  { %565 = vmatprep.subr.mxu1 %v113_v34  ;;  %531 = vmatpush3.msra.mxu0 %v65_v35  ;;  %v93_v52 = vld [vmem:[#allocation5 + $0x118] sm:$0xff]  ;;  %v92_v56 = vld [vmem:[#allocation5 + $0x110] sm:$0xff]  ;;  %v59_v59 = vld [vmem:[#allocation5 + $0x8] sm:$0xff] }
  0x2e   :  { %566 = vmatpush3.msra.mxu1 %v97_v36  ;;  %532 = vmatprep.subr.mxu0 %v80_v37  ;;  %v91_v60 = vld [vmem:[#allocation5 + $0x108] sm:$0xff]  ;;  %v74_v61 = vld [vmem:[#allocation5 + $0x80] sm:$0xff]  ;;  %v53_v2 = vld [vmem:[#allocation2 + $0x18] sm:$0xff] }
  0x2f   :  { %567 = vmatprep.subr.mxu1 %v112_v38  ;;  %533 = vmatpush3.msra.mxu0 %v64_v39  ;;  %v106_v62 = vld [vmem:[#allocation5 + $0x180] sm:$0xff]  ;;  %v51_v0 = vld [vmem:[#allocation2 + $0x8] sm:$0xff]  ;;  %v52_v4 = vld [vmem:[#allocation2 + $0x10] sm:$0xff] }
  0x30   :  { %568 = vmatpush3.msra.mxu1 %v96_v40  ;;  %534 = vmatprep.subr.mxu0 %v79_v41  ;;  %v58_v63 = vld [vmem:[#allocation5] sm:$0xff]  ;;  %v153_v5 = vld [vmem:[#allocation5 + $0x2f8] sm:$0xff]  ;;  %v152_v9 = vld [vmem:[#allocation5 + $0x2f0] sm:$0xff] }
  0x31   :  { %569 = vmatprep.subr.mxu1 %v111_v42  ;;  %535 = vmatpush3.msra.mxu0 %v63_v43  ;;  %v90_v1 = vld [vmem:[#allocation5 + $0x100] sm:$0xff]  ;;  %v185_v6 = vld [vmem:[#allocation5 + $0x3f8] sm:$0xff]  ;;  %v184_v10 = vld [vmem:[#allocation5 + $0x3f0] sm:$0xff] }
  0x32   :  { %570 = vmatpush3.msra.mxu1 %v95_v44  ;;  %536 = vmatprep.subr.mxu0 %v78_v45  ;;  %v50_v3 = vld [vmem:[#allocation2] sm:$0xff]  ;;  %v137_v7 = vld [vmem:[#allocation5 + $0x278] sm:$0xff]  ;;  %v136_v11 = vld [vmem:[#allocation5 + $0x270] sm:$0xff] }
  0x33   :  { %571 = vmatprep.subr.mxu1 %v110_v46  ;;  %537 = vmatpush3.msra.mxu0 %v62_v47  ;;  %v169_v8 = vld [vmem:[#allocation5 + $0x378] sm:$0xff]  ;;  %v168_v12 = vld [vmem:[#allocation5 + $0x370] sm:$0xff]  ;;  %v151_v13 = vld [vmem:[#allocation5 + $0x2e8] sm:$0xff] }
  0x34   :  { %572 = vmatpush3.msra.mxu1 %v94_v48  ;;  %538 = vmatprep.subr.mxu0 %v77_v49  ;;  %v183_v14 = vld [vmem:[#allocation5 + $0x3e8] sm:$0xff]  ;;  %v150_v17 = vld [vmem:[#allocation5 + $0x2e0] sm:$0xff]  ;;  %v149_v21 = vld [vmem:[#allocation5 + $0x2d8] sm:$0xff] }
  0x35   :  { %573 = vmatprep.subr.mxu1 %v109_v50  ;;  %539 = vmatpush3.msra.mxu0 %v61_v51  ;;  %v135_v15 = vld [vmem:[#allocation5 + $0x268] sm:$0xff]  ;;  %v182_v18 = vld [vmem:[#allocation5 + $0x3e0] sm:$0xff]  ;;  %v181_v22 = vld [vmem:[#allocation5 + $0x3d8] sm:$0xff] }
  0x36   :  { %574 = vmatpush3.msra.mxu1 %v93_v52  ;;  %540 = vmatprep.subr.mxu0 %v76_v53  ;;  %v167_v16 = vld [vmem:[#allocation5 + $0x368] sm:$0xff]  ;;  %v134_v19 = vld [vmem:[#allocation5 + $0x260] sm:$0xff]  ;;  %v133_v23 = vld [vmem:[#allocation5 + $0x258] sm:$0xff] }
  0x37   :  { %575 = vmatprep.subr.mxu1 %v108_v54  ;;  %541 = vmatpush3.msra.mxu0 %v60_v55  ;;  %v166_v20 = vld [vmem:[#allocation5 + $0x360] sm:$0xff]  ;;  %v165_v24 = vld [vmem:[#allocation5 + $0x358] sm:$0xff]  ;;  %v148_v25 = vld [vmem:[#allocation5 + $0x2d0] sm:$0xff] }
  0x38   :  { %576 = vmatpush3.msra.mxu1 %v92_v56  ;;  %542 = vmatprep.subr.mxu0 %v75_v57  ;;  %v180_v26 = vld [vmem:[#allocation5 + $0x3d0] sm:$0xff]  ;;  %v147_v29 = vld [vmem:[#allocation5 + $0x2c8] sm:$0xff]  ;;  %v146_v33 = vld [vmem:[#allocation5 + $0x2c0] sm:$0xff] }
  0x39   :  { %577 = vmatprep.subr.mxu1 %v107_v58  ;;  %543 = vmatpush3.msra.mxu0 %v59_v59  ;;  %v132_v27 = vld [vmem:[#allocation5 + $0x250] sm:$0xff]  ;;  %v179_v30 = vld [vmem:[#allocation5 + $0x3c8] sm:$0xff]  ;;  %v178_v34 = vld [vmem:[#allocation5 + $0x3c0] sm:$0xff] }
  0x3a   :  { %578 = vmatpush3.msra.mxu1 %v91_v60  ;;  %544 = vmatprep.subr.mxu0 %v74_v61  ;;  %v164_v28 = vld [vmem:[#allocation5 + $0x350] sm:$0xff]  ;;  %v131_v31 = vld [vmem:[#allocation5 + $0x248] sm:$0xff]  ;;  %v130_v35 = vld [vmem:[#allocation5 + $0x240] sm:$0xff] }
  0x3b   :  { %579 = vmatprep.subr.mxu1 %v106_v62  ;;  %545 = vmatpush3.msra.mxu0 %v58_v63  ;;  %v163_v32 = vld [vmem:[#allocation5 + $0x348] sm:$0xff]  ;;  %v162_v36 = vld [vmem:[#allocation5 + $0x340] sm:$0xff]  ;;  %v145_v37 = vld [vmem:[#allocation5 + $0x2b8] sm:$0xff] }
  0x3c   :  { %250 = vmatprep.mubr.f32.mxu0 %v51_v0  ;;  %580 = vmatpush3.msra.mxu1 %v90_v1  ;;  %v177_v38 = vld [vmem:[#allocation5 + $0x3b8] sm:$0xff]  ;;  %v144_v41 = vld [vmem:[#allocation5 + $0x2b0] sm:$0xff]  ;;  %v143_v45 = vld [vmem:[#allocation5 + $0x2a8] sm:$0xff] }
  0x3d   :  { %320 = vmatprep.mubr.f32.mxu1 %v53_v2  ;;  %251 = vmatmul.mubr.f32.vlgmr.msra.gmra.mxu0 %v50_v3  ;;  %v129_v39 = vld [vmem:[#allocation5 + $0x238] sm:$0xff]  ;;  %v176_v42 = vld [vmem:[#allocation5 + $0x3b0] sm:$0xff]  ;;  %v175_v46 = vld [vmem:[#allocation5 + $0x3a8] sm:$0xff] }
  0x3e   :  { %321 = vmatmul.mubr.f32.vlgmr.msra.gmra.mxu1 %v52_v4  ;;  %584 = vmatprep.subr.mxu0 %v153_v5  ;;  %v161_v40 = vld [vmem:[#allocation5 + $0x338] sm:$0xff]  ;;  %v128_v43 = vld [vmem:[#allocation5 + $0x230] sm:$0xff]  ;;  %v127_v47 = vld [vmem:[#allocation5 + $0x228] sm:$0xff] }
  0x3f   :  { %619 = vmatprep.subr.mxu1 %v185_v6  ;;  %585 = vmatpush3.msra.mxu0 %v137_v7  ;;  %v160_v44 = vld [vmem:[#allocation5 + $0x330] sm:$0xff]  ;;  %v159_v48 = vld [vmem:[#allocation5 + $0x328] sm:$0xff]  ;;  %v142_v49 = vld [vmem:[#allocation5 + $0x2a0] sm:$0xff] }
  0x40   :  { %620 = vmatpush3.msra.mxu1 %v169_v8  ;;  %586 = vmatprep.subr.mxu0 %v152_v9  ;;  %v174_v50 = vld [vmem:[#allocation5 + $0x3a0] sm:$0xff]  ;;  %v141_v53 = vld [vmem:[#allocation5 + $0x298] sm:$0xff]  ;;  %v140_v57 = vld [vmem:[#allocation5 + $0x290] sm:$0xff] }
  0x41   :  { %621 = vmatprep.subr.mxu1 %v184_v10  ;;  %587 = vmatpush3.msra.mxu0 %v136_v11  ;;  %v126_v51 = vld [vmem:[#allocation5 + $0x220] sm:$0xff]  ;;  %v173_v54 = vld [vmem:[#allocation5 + $0x398] sm:$0xff]  ;;  %v172_v58 = vld [vmem:[#allocation5 + $0x390] sm:$0xff] }
  0x42   :  { %622 = vmatpush3.msra.mxu1 %v168_v12  ;;  %588 = vmatprep.subr.mxu0 %v151_v13  ;;  %v158_v52 = vld [vmem:[#allocation5 + $0x320] sm:$0xff]  ;;  %v125_v55 = vld [vmem:[#allocation5 + $0x218] sm:$0xff]  ;;  %v124_v59 = vld [vmem:[#allocation5 + $0x210] sm:$0xff] }
  0x43   :  { %623 = vmatprep.subr.mxu1 %v183_v14  ;;  %589 = vmatpush3.msra.mxu0 %v135_v15  ;;  %v157_v56 = vld [vmem:[#allocation5 + $0x318] sm:$0xff]  ;;  %v156_v60 = vld [vmem:[#allocation5 + $0x310] sm:$0xff]  ;;  %v139_v61 = vld [vmem:[#allocation5 + $0x288] sm:$0xff] }
  0x44   :  { %624 = vmatpush3.msra.mxu1 %v167_v16  ;;  %590 = vmatprep.subr.mxu0 %v150_v17  ;;  %v171_v62 = vld [vmem:[#allocation5 + $0x388] sm:$0xff]  ;;  %v138_v1 = vld [vmem:[#allocation5 + $0x280] sm:$0xff]  ;;  %v57_v6 = vld [vmem:[#allocation2 + $0x38] sm:$0xff] }
  0x45   :  { %625 = vmatprep.subr.mxu1 %v182_v18  ;;  %591 = vmatpush3.msra.mxu0 %v134_v19  ;;  %v123_v63 = vld [vmem:[#allocation5 + $0x208] sm:$0xff]  ;;  %v170_v2 = vld [vmem:[#allocation5 + $0x380] sm:$0xff]  ;;  %v56_v8 = vld [vmem:[#allocation2 + $0x30] sm:$0xff] }
  0x46   :  { %626 = vmatpush3.msra.mxu1 %v166_v20  ;;  %592 = vmatprep.subr.mxu0 %v149_v21  ;;  %v155_v0 = vld [vmem:[#allocation5 + $0x308] sm:$0xff]  ;;  %v122_v3 = vld [vmem:[#allocation5 + $0x200] sm:$0xff] }
  0x47   :  { %627 = vmatprep.subr.mxu1 %v181_v22  ;;  %593 = vmatpush3.msra.mxu0 %v133_v23  ;;  %v55_v4 = vld [vmem:[#allocation2 + $0x28] sm:$0xff]  ;;  %v154_v5 = vld [vmem:[#allocation5 + $0x300] sm:$0xff] }
  0x48   :  { %628 = vmatpush3.msra.mxu1 %v165_v24  ;;  %594 = vmatprep.subr.mxu0 %v148_v25  ;;  %v54_v7 = vld [vmem:[#allocation2 + $0x20] sm:$0xff] }
  0x49   :  { %629 = vmatprep.subr.mxu1 %v180_v26  ;;  %595 = vmatpush3.msra.mxu0 %v132_v27  ;;  %v471_v9 = vld [vmem:[%s778_s2] sm:$0xff] }
  0x4a   :  { %630 = vmatpush3.msra.mxu1 %v164_v28  ;;  %596 = vmatprep.subr.mxu0 %v147_v29  ;;  %v513_v24 = vld [vmem:[%s779_s3] ss:$0 sm:$0xff] }
  0x4b   :  { %631 = vmatprep.subr.mxu1 %v179_v30  ;;  %597 = vmatpush3.msra.mxu0 %v131_v31 }
  0x4c   :  { %632 = vmatpush3.msra.mxu1 %v163_v32  ;;  %598 = vmatprep.subr.mxu0 %v146_v33 }
  0x4d   :  { %633 = vmatprep.subr.mxu1 %v178_v34  ;;  %599 = vmatpush3.msra.mxu0 %v130_v35 }
  0x4e   :  { %634 = vmatpush3.msra.mxu1 %v162_v36  ;;  %600 = vmatprep.subr.mxu0 %v145_v37 }
  0x4f   :  { %635 = vmatprep.subr.mxu1 %v177_v38  ;;  %601 = vmatpush3.msra.mxu0 %v129_v39 }
  0x50   :  { %636 = vmatpush3.msra.mxu1 %v161_v40  ;;  %602 = vmatprep.subr.mxu0 %v144_v41 }
  0x51   :  { %637 = vmatprep.subr.mxu1 %v176_v42  ;;  %603 = vmatpush3.msra.mxu0 %v128_v43 }
  0x52   :  { %638 = vmatpush3.msra.mxu1 %v160_v44  ;;  %604 = vmatprep.subr.mxu0 %v143_v45 }
  0x53   :  { %639 = vmatprep.subr.mxu1 %v175_v46  ;;  %605 = vmatpush3.msra.mxu0 %v127_v47 }
  0x54   :  { %640 = vmatpush3.msra.mxu1 %v159_v48  ;;  %606 = vmatprep.subr.mxu0 %v142_v49 }
  0x55   :  { %641 = vmatprep.subr.mxu1 %v174_v50  ;;  %607 = vmatpush3.msra.mxu0 %v126_v51 }
  0x56   :  { %642 = vmatpush3.msra.mxu1 %v158_v52  ;;  %608 = vmatprep.subr.mxu0 %v141_v53 }
  0x57   :  { %643 = vmatprep.subr.mxu1 %v173_v54  ;;  %609 = vmatpush3.msra.mxu0 %v125_v55 }
  0x58   :  { %644 = vmatpush3.msra.mxu1 %v157_v56  ;;  %610 = vmatprep.subr.mxu0 %v140_v57 }
  0x59   :  { %645 = vmatprep.subr.mxu1 %v172_v58  ;;  %611 = vmatpush3.msra.mxu0 %v124_v59 }
  0x5a   :  { %646 = vmatpush3.msra.mxu1 %v156_v60  ;;  %612 = vmatprep.subr.mxu0 %v139_v61 }
  0x5b   :  { %647 = vmatprep.subr.mxu1 %v171_v62  ;;  %613 = vmatpush3.msra.mxu0 %v123_v63 }
  0x5c   :  { %648 = vmatpush3.msra.mxu1 %v155_v0  ;;  %614 = vmatprep.subr.mxu0 %v138_v1 }
  0x5d   :  { %649 = vmatprep.subr.mxu1 %v170_v2  ;;  %615 = vmatpush3.msra.mxu0 %v122_v3 }
  0x5e   :  { %390 = vmatprep.mubr.f32.mxu0 %v55_v4  ;;  %650 = vmatpush3.msra.mxu1 %v154_v5 }
  0x5f   :  { %460 = vmatprep.mubr.f32.mxu1 %v57_v6  ;;  %391 = vmatmul.mubr.f32.vlgmr.msra.gmra.mxu0 %v54_v7 }
  0x60   :  { %461 = vmatmul.mubr.f32.vlgmr.msra.gmra.mxu1 %v56_v8  ;;  %475 = vperm.xlu0 %661, %v471_v9  }
  0xdb   :  { %v476_v25 = vpop.permute.xlu0 %475 }
  0xdc   :  { %v484_v27 = vadd.f32 %v513_v24, %v476_v25 }
  0xfd   :  { %v546_v10 = vpop.f32.mrf.mxu0 }
  0xfe   :  { %v581_v11 = vpop.f32.mrf.mxu1 }
  0xff   :  { %v547_v12 = vpop.f32.mrf.mxu0 }
 0x100   :  { %v582_v13 = vpop.f32.mrf.mxu1  ;;  %v548_v14 = vadd.f32 %v547_v12, %v546_v10 }
 0x101   :  { %v583_v15 = vadd.f32 %v582_v13, %v581_v11 }
 0x103   :  { %v323_v20 = vadd.f32 %v583_v15, %v548_v14 }
 0x11f   :  { %v616_v16 = vpop.f32.mrf.mxu0 }
 0x120   :  { %v651_v17 = vpop.f32.mrf.mxu1 }
 0x121   :  { %v617_v18 = vpop.f32.mrf.mxu0 }
 0x122   :  { %v652_v19 = vpop.f32.mrf.mxu1  ;;  %v618_v21 = vadd.f32 %v617_v18, %v616_v16 }
 0x123   :  { %v653_v23 = vadd.f32 %v652_v19, %v651_v17 }
 0x124   :  { %v393_v22 = vadd.f32 %v618_v21, %v323_v20 }
 0x126   :  { %v463_v26 = vadd.f32 %v653_v23, %v393_v22 }
 0x128   :  { %v486_v28 = vmul.f32 2.0, %v463_v26 }
 0x12a   :  { %v487_v29 = vsub.f32 %v484_v27, %v486_v28 }
 0x12c   :  { %v488_v30 = vmax.f32 %v487_v29, 1e-12 }
 0x12e   :  { %662 = vrsqrt.f32 %v488_v30  ;;  %vm491_vm0 = vcmp.eq.f32.partialorder %v488_v30, inf  ;;  %v494_v33 = vand.u32 2147483648, %v488_v30  ;;  %vm493_vm1 = vcmp.eq.f32.partialorder %v488_v30, 0.0 }
 0x13b   :  { %v663_v31 = vpop.eup %662 }
 0x13c   :  { %v490_v32 = vmul.f32 %v663_v31, %v488_v30 }
 0x13e   :  { %v492_v34 = vsel %vm491_vm0, %v488_v30, %v490_v32 }
 0x13f   :  { %v495_v35 = vsel %vm493_vm1, %v494_v33, %v492_v34 }
 0x140   :  { %496 = vst [vmem:[#allocation7] sm:$0xff] %v495_v35 }
 0x141   :  { %715 = shalt.err (!%p712_p0)
}
 0x142   :  { %506 = dma.vmem_to_hbm [thread:$0]  %s504_s29, 128, %s780_s4, [#allocation4]  }
 0x143   :  { %728 = dma.done.wait [#allocation4], 128  }
 0x144   :  { %729 = vsyncadd [#allocation4], 4294967168 }
 0x145   :  { %510 = vsyncpa [#allocation3], 1 }
 0x146   :  { %511 = vsyncpa [#allocation6], 1 }
 0x147   :  { %512 = vsyncpa [#allocation4], 1 }

</bundles_post_ra>
